<compile_context>
chip_gen: v7x
topology: tpu7x:2x2x1
jax: 0.10.0
libtpu: 0.0.40
codegen_flags: <defaults>
</compile_context>

<pallas_src>
import jax
import jax.numpy as jnp
from jax import lax
from jax.experimental import pallas as pl
from jax.experimental.pallas import tpu as pltpu


def _preadout_rollout_kernel(
    xs_ref,      # [B, D]    per-step input (leading T squeezed)
    mods_ref,    # [O, 1]    per-step modulator, pre-transposed to a column
    state0_ref,  # [2, O, D] initial (dU, trace_STDP)
    tpre0_ref,   # [B, D]    initial trace_pre
    tpost0_ref,  # [B, O]    initial trace_post
    W_ref,       # [O, D]    h2o.weight
    preg_ref,    # [2, D]    rows: sigmoid(tau_pre), 1 - sigmoid(tau_pre)
    rowg_ref,    # [3, O]    rows: bias, sigmoid(tau_post), 1 - sigmoid(tau_post)
    colg_ref,    # [O, 5]    cols: s_U, 1-s_U, s_STDP, 1-s_STDP, s_alpha
    o_ref,       # [B, O]    per-step softmax output (leading T squeezed)
    state_ref,   # [2, O, D] VMEM-resident (dU, trace_STDP)
    tpre_ref,    # [B, D]    VMEM-resident trace_pre
    tpost_ref,   # [B, O]    VMEM-resident trace_post
):
    t = pl.program_id(0)

    # Load the initial recurrent state into the resident output blocks once.
    @pl.when(t == 0)
    def _():
        state_ref[...] = state0_ref[...]
        tpre_ref[...] = tpre0_ref[...]
        tpost_ref[...] = tpost0_ref[...]

    x = xs_ref[...]                      # [B, D]
    mod_col = mods_ref[...]              # [O, 1]  (== mod.t() in the torch code)
    dU = state_ref[0]                    # [O, D]
    trace_STDP = state_ref[1]            # [O, D]
    trace_pre = tpre_ref[...]            # [B, D]
    trace_post = tpost_ref[...]          # [B, O]

    # Precomputed gates (sliced from packed slabs; no per-step sigmoids).
    s_pre, s_pre_c = preg_ref[0:1, :], preg_ref[1:2, :]                       # [1, D]
    b = rowg_ref[0:1, :]                                                      # [1, O]
    s_post, s_post_c = rowg_ref[1:2, :], rowg_ref[2:3, :]                     # [1, O]
    s_U, s_U_c = colg_ref[:, 0:1], colg_ref[:, 1:2]                           # [O, 1]
    s_STDP, s_STDP_c = colg_ref[:, 2:3], colg_ref[:, 3:4]                     # [O, 1]
    s_alpha = colg_ref[:, 4:5]                                                # [O, 1]

    # new_dU = (1 - sig(tau_U)) * dU + sig(tau_U) * tanh(mod.T) * trace_STDP
    new_dU = s_U_c * dU + s_U * (jnp.tanh(mod_col) * trace_STDP)              # [O, D]

    # logits = x@W.T + b + sig(alpha)*(x@new_dU.T)
    #        = x @ (W + sig(alpha).T * new_dU).T + b      (single MXU matmul)
    W_eff = W_ref[...] + s_alpha * new_dU                                     # [O, D]
    dn_feat = (((1,), (1,)), ((), ()))                                        # contract D
    logits = lax.dot_general(x, W_eff, dn_feat,
                             preferred_element_type=jnp.float32) + b          # [B, O]

    # softmax(dim=1)
    m = jnp.max(logits, axis=1, keepdims=True)
    e = jnp.exp(logits - m)
    o = e * pl.reciprocal(jnp.sum(e, axis=1, keepdims=True), approx=False)    # [B, O]

    # Trace updates: exact reference form; STDP uses the OLD pre/post traces.
    new_tpre = s_pre_c * trace_pre + s_pre * x                                # [B, D]
    new_tpost = s_post_c * trace_post + s_post * o                            # [B, O]

    dn_batch = (((0,), (0,)), ((), ()))                                       # contract B
    stdp = (lax.dot_general(o, trace_pre, dn_batch, preferred_element_type=jnp.float32)
            - lax.dot_general(trace_post, x, dn_batch, preferred_element_type=jnp.float32))
    new_tstdp = s_STDP_c * trace_STDP + s_STDP * stdp                         # [O, D]

    o_ref[...] = o.astype(o_ref.dtype)
    state_ref[0] = new_dU
    state_ref[1] = new_tstdp
    tpre_ref[...] = new_tpre
    tpost_ref[...] = new_tpost


@jax.jit
def preadout_rollout(xs, dU, trace, mods, params):
    """Run T PReadOut steps inside ONE pallas_call (state resident in VMEM).

    xs: [T, B, D], mods: [T, 1, O].
    Returns (o_seq [T,B,O], new_dU, (new_trace_pre, new_trace_post, new_trace_STDP)).
    """
    trace_pre, trace_post, trace_STDP = trace
    W, b, tau_pre, tau_post, tau_U, tau_STDP, alpha = params

    T, B, D = xs.shape
    O = W.shape[0]
    f32 = jnp.float32

    # --- parameter-derived gates, computed ONCE per rollout and packed ---
    sig = jax.nn.sigmoid
    s_pre = sig(tau_pre).reshape(1, D)
    s_post = sig(tau_post).reshape(1, O)
    s_U = sig(tau_U).reshape(O, 1)
    s_STDP = sig(tau_STDP).reshape(O, 1)
    s_alpha = sig(alpha).reshape(O, 1)

    preg = jnp.concatenate([s_pre, 1.0 - s_pre], axis=0).astype(f32)                       # [2, D]
    rowg = jnp.concatenate([b.reshape(1, O), s_post, 1.0 - s_post], axis=0).astype(f32)    # [3, O]
    colg = jnp.concatenate([s_U, 1.0 - s_U, s_STDP, 1.0 - s_STDP, s_alpha],
                           axis=1).astype(f32)                                             # [O, 5]

    mods_col = jnp.transpose(mods, (0, 2, 1)).astype(f32)                                  # [T, O, 1]
    state0 = jnp.stack([dU, trace_STDP]).astype(f32)                                       # [2, O, D]

    # Advisory cost hint for XLA scheduling around the call.
    flops = int(T * (6 * B * D * O + 12 * O * D + 8 * B * D + 10 * B * O))
    transcendentals = int(T * (B * O + O))
    bytes_accessed = int(4 * (xs.size + mods_col.size + 2 * state0.size
                              + 2 * trace_pre.size + 2 * trace_post.size
                              + W.size + preg.size + rowg.size + colg.size + T * B * O))

    o_seq, state_out, tpre_out, tpost_out = pl.pallas_call(
        _preadout_rollout_kernel,
        grid=(T,),
        in_specs=[
            pl.BlockSpec((None, B, D), lambda t: (t, 0, 0)),   # xs     (per step)
            pl.BlockSpec((None, O, 1), lambda t: (t, 0, 0)),   # mods   (per step, column)
            pl.BlockSpec((2, O, D),    lambda t: (0, 0, 0)),   # state0 (DMA'd once)
            pl.BlockSpec((B, D),       lambda t: (0, 0)),      # trace_pre0
            pl.BlockSpec((B, O),       lambda t: (0, 0)),      # trace_post0
            pl.BlockSpec((O, D),       lambda t: (0, 0)),      # W
            pl.BlockSpec((2, D),       lambda t: (0, 0)),      # pre gates
            pl.BlockSpec((3, O),       lambda t: (0, 0)),      # row-O gates (b, s_post, 1-s_post)
            pl.BlockSpec((O, 5),       lambda t: (0, 0)),      # col-O gates
        ],
        out_specs=(
            pl.BlockSpec((None, B, O), lambda t: (t, 0, 0)),   # o per step
            pl.BlockSpec((2, O, D),    lambda t: (0, 0, 0)),   # resident (dU, trace_STDP)
            pl.BlockSpec((B, D),       lambda t: (0, 0)),      # resident trace_pre
            pl.BlockSpec((B, O),       lambda t: (0, 0)),      # resident trace_post
        ),
        out_shape=(
            jax.ShapeDtypeStruct((T, B, O), f32),
            jax.ShapeDtypeStruct((2, O, D), f32),
            jax.ShapeDtypeStruct((B, D), f32),
            jax.ShapeDtypeStruct((B, O), f32),
        ),
        # In-place recurrent-state write-back (stacked dU/STDP, trace_pre, trace_post).
        # Note: these inputs are logically donated; XLA copies if the caller still owns them.
        input_output_aliases={2: 1, 3: 2, 4: 3},
        compiler_params=pltpu.CompilerParams(dimension_semantics=("arbitrary",)),
        cost_estimate=pl.CostEstimate(flops=flops, transcendentals=transcendentals,
                                      bytes_accessed=bytes_accessed),
    )(xs.astype(f32), mods_col, state0, trace_pre.astype(f32), trace_post.astype(f32),
      W.astype(f32), preg, rowg, colg)

    new_dU = state_out[0]
    new_tstdp = state_out[1]
    return o_seq, new_dU, (tpre_out, tpost_out, new_tstdp)


def preadout_forward(x, dU, trace, mod, params):
    """Single-step PReadOut.forward (out_type='categorical') == T=1 rollout."""
    o_seq, new_dU, (ntp, ntpo, nts) = preadout_rollout(x[None], dU, trace, mod[None], params)
    return o_seq[0], new_dU, (ntp, ntpo, nts)


def preadout_reference(x, dU, trace, mod, params):
    """Pure-JAX reference matching the PyTorch forward exactly."""
    trace_pre, trace_post, trace_STDP = trace
    W, b, tau_pre, tau_post, tau_U, tau_STDP, alpha = params
    sig = jax.nn.sigmoid
    new_dU = (1 - sig(tau_U)) * dU + sig(tau_U) * jnp.tanh(mod.T) * trace_STDP
    logits = x @ W.T + b + sig(alpha) * (x @ new_dU.T)
    o = jax.nn.softmax(logits, axis=1)
    new_tpre = (1 - sig(tau_pre)) * trace_pre + sig(tau_pre) * x
    new_tpost = (1 - sig(tau_post)) * trace_post + sig(tau_post) * o
    new_tstdp = (1 - sig(tau_STDP)) * trace_STDP + sig(tau_STDP) * (
        o.T @ trace_pre - trace_post.T @ x)
    return o, new_dU, (new_tpre, new_tpost, new_tstdp)


if __name__ == "__main__":
    B, D, O, T = 8, 32, 16, 8   # batch, input_dim, out_dim, rollout steps

    key = jax.random.PRNGKey(0)
    keys = jax.random.split(key, 13)

    # deterministic parameter init (mirrors the torch __init__ shapes)
    limit = 1.0 / jnp.sqrt(D)
    W        = jax.random.uniform(keys[0], (O, D), jnp.float32, -limit, limit)   # h2o.weight
    b        = jax.random.uniform(keys[1], (O,),   jnp.float32, -limit, limit)   # h2o.bias
    tau_pre  = jax.random.normal(keys[2], (1, D), jnp.float32) - 3.0
    tau_post = jax.random.normal(keys[3], (1, O), jnp.float32) - 3.0
    tau_U    = jax.random.normal(keys[4], (O, 1), jnp.float32) - 3.0
    tau_STDP = jax.random.normal(keys[5], (O, 1), jnp.float32) - 3.0
    alpha    = jax.random.normal(keys[6], (1, O), jnp.float32) - 3.0
    params = (W, b, tau_pre, tau_post, tau_U, tau_STDP, alpha)

    # deterministic inputs / initial recurrent state
    dU         = jax.random.normal(keys[7],  (O, D), jnp.float32) * 0.1
    trace_pre  = jax.random.normal(keys[8],  (B, D), jnp.float32) * 0.1
    trace_post = jax.random.normal(keys[9],  (B, O), jnp.float32) * 0.1
    trace_STDP = jax.random.normal(keys[10], (O, D), jnp.float32) * 0.1
    trace = (trace_pre, trace_post, trace_STDP)

    xs   = jax.random.normal(keys[11], (T, B, D), jnp.float32)
    mods = jax.random.normal(keys[12], (T, 1, O), jnp.float32)

    def close(a, r, tol):
        return bool(jnp.allclose(a, r, atol=tol, rtol=tol))

    # --- single-step check (exactly the original module forward) ---
    o_r, dU_r, (ntp_r, ntpo_r, nts_r) = preadout_reference(xs[0], dU, trace, mods[0], params)
    o1, dU1, (ntp1, ntpo1, nts1) = preadout_forward(xs[0], dU, trace, mods[0], params)
    jax.block_until_ready((o1, dU1, ntp1, ntpo1, nts1))
    ok1 = all(close(a, r, 1e-5) for a, r in
              [(o1, o_r), (dU1, dU_r), (ntp1, ntp_r), (ntpo1, ntpo_r), (nts1, nts_r)])
    assert ok1, "single-step Pallas output mismatch vs reference"

    # --- T-step rollout check (time loop fused inside one pallas_call) ---
    dU_ref, tr_ref = dU, trace
    o_ref_seq = []
    for t in range(T):
        o_t, dU_ref, tr_ref = preadout_reference(xs[t], dU_ref, tr_ref, mods[t], params)
        o_ref_seq.append(o_t)
    o_ref_seq = jnp.stack(o_ref_seq)

    o_seq, dU_T, (tpre_T, tpost_T, tstdp_T) = preadout_rollout(xs, dU, trace, mods, params)
    jax.block_until_ready((o_seq, dU_T, tpre_T, tpost_T, tstdp_T))
    ok2 = all(close(a, r, 1e-4) for a, r in
              [(o_seq, o_ref_seq), (dU_T, dU_ref), (tpre_T, tr_ref[0]),
               (tpost_T, tr_ref[1]), (tstdp_T, tr_ref[2])])
    assert ok2, "rollout Pallas output mismatch vs reference"

    print("KERNEL_OK")
</pallas_src>

<mosaic_0001>
module attributes {stable_mosaic.version = 11 : i64} {
  func.func @_preadout_rollout_kernel(%arg0: i32, %arg1: memref<1x8x32xf32, #tpu.memory_space<vmem>>, %arg2: memref<1x16x1xf32, #tpu.memory_space<vmem>>, %arg3: memref<2x16x32xf32, #tpu.memory_space<vmem>>, %arg4: memref<8x32xf32, #tpu.memory_space<vmem>>, %arg5: memref<8x16xf32, #tpu.memory_space<vmem>>, %arg6: memref<16x32xf32, #tpu.memory_space<vmem>>, %arg7: memref<2x32xf32, #tpu.memory_space<vmem>>, %arg8: memref<3x16xf32, #tpu.memory_space<vmem>>, %arg9: memref<16x5xf32, #tpu.memory_space<vmem>>, %arg10: memref<1x8x16xf32, #tpu.memory_space<vmem>>, %arg11: memref<2x16x32xf32, #tpu.memory_space<vmem>>, %arg12: memref<8x32xf32, #tpu.memory_space<vmem>>, %arg13: memref<8x16xf32, #tpu.memory_space<vmem>>) attributes {dimension_semantics = [#tpu.dimension_semantics<arbitrary>], iteration_bounds = array<i64: 1>, scalar_prefetch = 0 : i64, scratch_operands = 0 : i64, tpu.core_type = #tpu.core_type<tc>, window_params = [{transform_indices = @transform_0, window_bounds = array<i64: 1, 8, 32>}, {transform_indices = @transform_1, window_bounds = array<i64: 1, 16, 1>}, {pipeline_mode = #tpu.pipeline_mode<synchronous>, transform_indices = @transform_2, window_bounds = array<i64: 2, 16, 32>}, {pipeline_mode = #tpu.pipeline_mode<synchronous>, transform_indices = @transform_3, window_bounds = array<i64: 8, 32>}, {pipeline_mode = #tpu.pipeline_mode<synchronous>, transform_indices = @transform_4, window_bounds = array<i64: 8, 16>}, {pipeline_mode = #tpu.pipeline_mode<synchronous>, transform_indices = @transform_5, window_bounds = array<i64: 16, 32>}, {pipeline_mode = #tpu.pipeline_mode<synchronous>, transform_indices = @transform_6, window_bounds = array<i64: 2, 32>}, {pipeline_mode = #tpu.pipeline_mode<synchronous>, transform_indices = @transform_7, window_bounds = array<i64: 3, 16>}, {pipeline_mode = #tpu.pipeline_mode<synchronous>, transform_indices = @transform_8, window_bounds = array<i64: 16, 5>}, {transform_indices = @transform_9, window_bounds = array<i64: 1, 8, 16>}, {pipeline_mode = #tpu.pipeline_mode<synchronous>, transform_indices = @transform_10, window_bounds = array<i64: 2, 16, 32>}, {pipeline_mode = #tpu.pipeline_mode<synchronous>, transform_indices = @transform_11, window_bounds = array<i64: 8, 32>}, {pipeline_mode = #tpu.pipeline_mode<synchronous>, transform_indices = @transform_12, window_bounds = array<i64: 8, 16>}]} {
    %c0_i32 = arith.constant 0 : i32
    %0 = arith.cmpi eq, %arg0, %c0_i32 : i32
    %1 = arith.extui %0 : i1 to i32
    %c0_i32_0 = arith.constant 0 : i32
    %2 = arith.cmpi ne, %1, %c0_i32_0 : i32
    scf.if %2 {
      %c0_51 = arith.constant 0 : index
      %c0_52 = arith.constant 0 : index
      %c0_53 = arith.constant 0 : index
      %77 = vector.load %arg3[%c0_51, %c0_52, %c0_53] : memref<2x16x32xf32, #tpu.memory_space<vmem>>, vector<2x16x32xf32>
      %c0_54 = arith.constant 0 : index
      %c0_55 = arith.constant 0 : index
      %c0_56 = arith.constant 0 : index
      %78 = vector.load %arg11[%c0_54, %c0_55, %c0_56] : memref<2x16x32xf32, #tpu.memory_space<vmem>>, vector<2x16x32xf32>
      tpu.vector_store %arg11[%c0_54, %c0_55, %c0_56], %77 {strides = array<i32>} : memref<2x16x32xf32, #tpu.memory_space<vmem>>, vector<2x16x32xf32>,
      %c0_57 = arith.constant 0 : index
      %c0_58 = arith.constant 0 : index
      %79 = vector.load %arg4[%c0_57, %c0_58] : memref<8x32xf32, #tpu.memory_space<vmem>>, vector<8x32xf32>
      %c0_59 = arith.constant 0 : index
      %c0_60 = arith.constant 0 : index
      %80 = vector.load %arg12[%c0_59, %c0_60] : memref<8x32xf32, #tpu.memory_space<vmem>>, vector<8x32xf32>
      tpu.vector_store %arg12[%c0_59, %c0_60], %79 {strides = array<i32>} : memref<8x32xf32, #tpu.memory_space<vmem>>, vector<8x32xf32>,
      %c0_61 = arith.constant 0 : index
      %c0_62 = arith.constant 0 : index
      %81 = vector.load %arg5[%c0_61, %c0_62] : memref<8x16xf32, #tpu.memory_space<vmem>>, vector<8x16xf32>
      %c0_63 = arith.constant 0 : index
      %c0_64 = arith.constant 0 : index
      %82 = vector.load %arg13[%c0_63, %c0_64] : memref<8x16xf32, #tpu.memory_space<vmem>>, vector<8x16xf32>
      tpu.vector_store %arg13[%c0_63, %c0_64], %81 {strides = array<i32>} : memref<8x16xf32, #tpu.memory_space<vmem>>, vector<8x16xf32>,
    } else {
    }
    %c0 = arith.constant 0 : index
    %c0_1 = arith.constant 0 : index
    %c0_2 = arith.constant 0 : index
    %3 = vector.load %arg1[%c0, %c0_1, %c0_2] : memref<1x8x32xf32, #tpu.memory_space<vmem>>, vector<1x8x32xf32>
    %4 = vector.shape_cast %3 : vector<1x8x32xf32> to vector<8x32xf32>
    %c0_3 = arith.constant 0 : index
    %c0_4 = arith.constant 0 : index
    %c0_5 = arith.constant 0 : index
    %5 = vector.load %arg2[%c0_3, %c0_4, %c0_5] : memref<1x16x1xf32, #tpu.memory_space<vmem>>, vector<1x16x1xf32>
    %6 = vector.shape_cast %5 : vector<1x16x1xf32> to vector<16x1xf32>
    %c0_6 = arith.constant 0 : index
    %c0_7 = arith.constant 0 : index
    %c0_8 = arith.constant 0 : index
    %7 = vector.load %arg11[%c0_6, %c0_7, %c0_8] : memref<2x16x32xf32, #tpu.memory_space<vmem>>, vector<1x16x32xf32>
    %8 = vector.shape_cast %7 : vector<1x16x32xf32> to vector<16x32xf32>
    %c1 = arith.constant 1 : index
    %c0_9 = arith.constant 0 : index
    %c0_10 = arith.constant 0 : index
    %9 = vector.load %arg11[%c1, %c0_9, %c0_10] : memref<2x16x32xf32, #tpu.memory_space<vmem>>, vector<1x16x32xf32>
    %10 = vector.shape_cast %9 : vector<1x16x32xf32> to vector<16x32xf32>
    %c0_11 = arith.constant 0 : index
    %c0_12 = arith.constant 0 : index
    %11 = vector.load %arg12[%c0_11, %c0_12] : memref<8x32xf32, #tpu.memory_space<vmem>>, vector<8x32xf32>
    %c0_13 = arith.constant 0 : index
    %c0_14 = arith.constant 0 : index
    %12 = vector.load %arg13[%c0_13, %c0_14] : memref<8x16xf32, #tpu.memory_space<vmem>>, vector<8x16xf32>
    %c0_15 = arith.constant 0 : index
    %c0_16 = arith.constant 0 : index
    %13 = vector.load %arg7[%c0_15, %c0_16] : memref<2x32xf32, #tpu.memory_space<vmem>>, vector<1x32xf32>
    %c1_17 = arith.constant 1 : index
    %c0_18 = arith.constant 0 : index
    %14 = vector.load %arg7[%c1_17, %c0_18] : memref<2x32xf32, #tpu.memory_space<vmem>>, vector<1x32xf32>
    %c0_19 = arith.constant 0 : index
    %c0_20 = arith.constant 0 : index
    %15 = vector.load %arg8[%c0_19, %c0_20] : memref<3x16xf32, #tpu.memory_space<vmem>>, vector<1x16xf32>
    %c1_21 = arith.constant 1 : index
    %c0_22 = arith.constant 0 : index
    %16 = vector.load %arg8[%c1_21, %c0_22] : memref<3x16xf32, #tpu.memory_space<vmem>>, vector<1x16xf32>
    %c2 = arith.constant 2 : index
    %c0_23 = arith.constant 0 : index
    %17 = vector.load %arg8[%c2, %c0_23] : memref<3x16xf32, #tpu.memory_space<vmem>>, vector<1x16xf32>
    %c0_24 = arith.constant 0 : index
    %c0_25 = arith.constant 0 : index
    %18 = vector.load %arg9[%c0_24, %c0_25] : memref<16x5xf32, #tpu.memory_space<vmem>>, vector<16x1xf32>
    %c0_26 = arith.constant 0 : index
    %c1_27 = arith.constant 1 : index
    %19 = vector.load %arg9[%c0_26, %c1_27] : memref<16x5xf32, #tpu.memory_space<vmem>>, vector<16x1xf32>
    %c0_28 = arith.constant 0 : index
    %c2_29 = arith.constant 2 : index
    %20 = vector.load %arg9[%c0_28, %c2_29] : memref<16x5xf32, #tpu.memory_space<vmem>>, vector<16x1xf32>
    %c0_30 = arith.constant 0 : index
    %c3 = arith.constant 3 : index
    %21 = vector.load %arg9[%c0_30, %c3] : memref<16x5xf32, #tpu.memory_space<vmem>>, vector<16x1xf32>
    %c0_31 = arith.constant 0 : index
    %c4 = arith.constant 4 : index
    %22 = vector.load %arg9[%c0_31, %c4] : memref<16x5xf32, #tpu.memory_space<vmem>>, vector<16x1xf32>
    %23 = vector.broadcast %19 : vector<16x1xf32> to vector<16x32xf32>
    %24 = arith.mulf %23, %8 : vector<16x32xf32>
    %25 = math.tanh %6 : vector<16x1xf32>
    %26 = vector.broadcast %25 : vector<16x1xf32> to vector<16x32xf32>
    %27 = arith.mulf %26, %10 : vector<16x32xf32>
    %28 = vector.broadcast %18 : vector<16x1xf32> to vector<16x32xf32>
    %29 = arith.mulf %28, %27 : vector<16x32xf32>
    %30 = arith.addf %24, %29 : vector<16x32xf32>
    %c0_32 = arith.constant 0 : index
    %c0_33 = arith.constant 0 : index
    %31 = vector.load %arg6[%c0_32, %c0_33] : memref<16x32xf32, #tpu.memory_space<vmem>>, vector<16x32xf32>
    %32 = vector.broadcast %22 : vector<16x1xf32> to vector<16x32xf32>
    %33 = arith.mulf %32, %30 : vector<16x32xf32>
    %34 = arith.addf %31, %33 : vector<16x32xf32>
    %cst = arith.constant dense<0.000000e+00> : vector<8x16xf32>
    %35 = tpu.matmul %4, %34, %cst {dimension_numbers = #tpu.dot_dimension_numbers<[1], [1], [0], [0], [0, 0, 1, 0], [], []>} : vector<8x32xf32>, vector<16x32xf32>, vector<8x16xf32> -> vector<8x16xf32>
    %36 = vector.broadcast %15 : vector<1x16xf32> to vector<8x16xf32>
    %37 = arith.addf %35, %36 : vector<8x16xf32>
    %cst_34 = arith.constant dense<0xFF800000> : vector<8xf32>
    %38 = vector.multi_reduction <maximumf>, %37, %cst_34 [1] : vector<8x16xf32> to vector<8xf32>
    %39 = vector.shape_cast %38 : vector<8xf32> to vector<8x1xf32>
    %40 = vector.broadcast %39 : vector<8x1xf32> to vector<8x16xf32>
    %41 = arith.subf %37, %40 : vector<8x16xf32>
    %42 = math.exp %41 : vector<8x16xf32>
    %cst_35 = arith.constant dense<0.000000e+00> : vector<8xf32>
    %43 = vector.multi_reduction <add>, %42, %cst_35 [1] : vector<8x16xf32> to vector<8xf32>
    %44 = vector.shape_cast %43 : vector<8xf32> to vector<8x1xf32>
    %45 = tpu.reciprocal %44 : vector<8x1xf32> -> vector<8x1xf32>
    %46 = vector.broadcast %45 : vector<8x1xf32> to vector<8x16xf32>
    %47 = arith.mulf %42, %46 : vector<8x16xf32>
    %48 = vector.broadcast %14 : vector<1x32xf32> to vector<8x32xf32>
    %49 = arith.mulf %48, %11 : vector<8x32xf32>
    %50 = vector.broadcast %13 : vector<1x32xf32> to vector<8x32xf32>
    %51 = arith.mulf %50, %4 : vector<8x32xf32>
    %52 = arith.addf %49, %51 : vector<8x32xf32>
    %53 = vector.broadcast %17 : vector<1x16xf32> to vector<8x16xf32>
    %54 = arith.mulf %53, %12 : vector<8x16xf32>
    %55 = vector.broadcast %16 : vector<1x16xf32> to vector<8x16xf32>
    %56 = arith.mulf %55, %47 : vector<8x16xf32>
    %57 = arith.addf %54, %56 : vector<8x16xf32>
    %cst_36 = arith.constant dense<0.000000e+00> : vector<16x32xf32>
    %58 = tpu.matmul %47, %11, %cst_36 {dimension_numbers = #tpu.dot_dimension_numbers<[0], [0], [1], [1], [0, 1, 1, 1], [], []>} : vector<8x16xf32>, vector<8x32xf32>, vector<16x32xf32> -> vector<16x32xf32>
    %cst_37 = arith.constant dense<0.000000e+00> : vector<16x32xf32>
    %59 = tpu.matmul %12, %4, %cst_37 {dimension_numbers = #tpu.dot_dimension_numbers<[0], [0], [1], [1], [0, 1, 1, 1], [], []>} : vector<8x16xf32>, vector<8x32xf32>, vector<16x32xf32> -> vector<16x32xf32>
    %60 = arith.subf %58, %59 : vector<16x32xf32>
    %61 = vector.broadcast %21 : vector<16x1xf32> to vector<16x32xf32>
    %62 = arith.mulf %61, %10 : vector<16x32xf32>
    %63 = vector.broadcast %20 : vector<16x1xf32> to vector<16x32xf32>
    %64 = arith.mulf %63, %60 : vector<16x32xf32>
    %65 = arith.addf %62, %64 : vector<16x32xf32>
    %c0_38 = arith.constant 0 : index
    %c0_39 = arith.constant 0 : index
    %c0_40 = arith.constant 0 : index
    %66 = vector.load %arg10[%c0_38, %c0_39, %c0_40] : memref<1x8x16xf32, #tpu.memory_space<vmem>>, vector<1x8x16xf32>
    %67 = vector.shape_cast %66 : vector<1x8x16xf32> to vector<8x16xf32>
    %68 = vector.shape_cast %47 : vector<8x16xf32> to vector<1x8x16xf32>
    tpu.vector_store %arg10[%c0_38, %c0_39, %c0_40], %68 {strides = array<i32>} : memref<1x8x16xf32, #tpu.memory_space<vmem>>, vector<1x8x16xf32>,
    %c0_41 = arith.constant 0 : index
    %c0_42 = arith.constant 0 : index
    %c0_43 = arith.constant 0 : index
    %69 = vector.load %arg11[%c0_41, %c0_42, %c0_43] : memref<2x16x32xf32, #tpu.memory_space<vmem>>, vector<1x16x32xf32>
    %70 = vector.shape_cast %69 : vector<1x16x32xf32> to vector<16x32xf32>
    %71 = vector.shape_cast %30 : vector<16x32xf32> to vector<1x16x32xf32>
    tpu.vector_store %arg11[%c0_41, %c0_42, %c0_43], %71 {strides = array<i32>} : memref<2x16x32xf32, #tpu.memory_space<vmem>>, vector<1x16x32xf32>,
    %c1_44 = arith.constant 1 : index
    %c0_45 = arith.constant 0 : index
    %c0_46 = arith.constant 0 : index
    %72 = vector.load %arg11[%c1_44, %c0_45, %c0_46] : memref<2x16x32xf32, #tpu.memory_space<vmem>>, vector<1x16x32xf32>
    %73 = vector.shape_cast %72 : vector<1x16x32xf32> to vector<16x32xf32>
    %74 = vector.shape_cast %65 : vector<16x32xf32> to vector<1x16x32xf32>
    tpu.vector_store %arg11[%c1_44, %c0_45, %c0_46], %74 {strides = array<i32>} : memref<2x16x32xf32, #tpu.memory_space<vmem>>, vector<1x16x32xf32>,
    %c0_47 = arith.constant 0 : index
    %c0_48 = arith.constant 0 : index
    %75 = vector.load %arg12[%c0_47, %c0_48] : memref<8x32xf32, #tpu.memory_space<vmem>>, vector<8x32xf32>
    tpu.vector_store %arg12[%c0_47, %c0_48], %52 {strides = array<i32>} : memref<8x32xf32, #tpu.memory_space<vmem>>, vector<8x32xf32>,
    %c0_49 = arith.constant 0 : index
    %c0_50 = arith.constant 0 : index
    %76 = vector.load %arg13[%c0_49, %c0_50] : memref<8x16xf32, #tpu.memory_space<vmem>>, vector<8x16xf32>
    tpu.vector_store %arg13[%c0_49, %c0_50], %57 {strides = array<i32>} : memref<8x16xf32, #tpu.memory_space<vmem>>, vector<8x16xf32>,
    return
  }
  func.func @transform_0(%arg0: i32) -> (i32, i32, i32) {
    %c0_i32 = arith.constant 0 : i32
    %c0_i32_0 = arith.constant 0 : i32
    %c0_i32_1 = arith.constant 0 : i32
    return %arg0, %c0_i32, %c0_i32_0 : i32, i32, i32
  }
  func.func @transform_1(%arg0: i32) -> (i32, i32, i32) {
    %c0_i32 = arith.constant 0 : i32
    %c0_i32_0 = arith.constant 0 : i32
    %c0_i32_1 = arith.constant 0 : i32
    return %arg0, %c0_i32, %c0_i32_0 : i32, i32, i32
  }
  func.func @transform_2(%arg0: i32) -> (i32, i32, i32) {
    %c0_i32 = arith.constant 0 : i32
    %c0_i32_0 = arith.constant 0 : i32
    %c0_i32_1 = arith.constant 0 : i32
    %c0_i32_2 = arith.constant 0 : i32
    return %c0_i32, %c0_i32_0, %c0_i32_1 : i32, i32, i32
  }
  func.func @transform_3(%arg0: i32) -> (i32, i32) {
    %c0_i32 = arith.constant 0 : i32
    %c0_i32_0 = arith.constant 0 : i32
    %c0_i32_1 = arith.constant 0 : i32
    return %c0_i32, %c0_i32_0 : i32, i32
  }
  func.func @transform_4(%arg0: i32) -> (i32, i32) {
    %c0_i32 = arith.constant 0 : i32
    %c0_i32_0 = arith.constant 0 : i32
    %c0_i32_1 = arith.constant 0 : i32
    return %c0_i32, %c0_i32_0 : i32, i32
  }
  func.func @transform_5(%arg0: i32) -> (i32, i32) {
    %c0_i32 = arith.constant 0 : i32
    %c0_i32_0 = arith.constant 0 : i32
    %c0_i32_1 = arith.constant 0 : i32
    return %c0_i32, %c0_i32_0 : i32, i32
  }
  func.func @transform_6(%arg0: i32) -> (i32, i32) {
    %c0_i32 = arith.constant 0 : i32
    %c0_i32_0 = arith.constant 0 : i32
    %c0_i32_1 = arith.constant 0 : i32
    return %c0_i32, %c0_i32_0 : i32, i32
  }
  func.func @transform_7(%arg0: i32) -> (i32, i32) {
    %c0_i32 = arith.constant 0 : i32
    %c0_i32_0 = arith.constant 0 : i32
    %c0_i32_1 = arith.constant 0 : i32
    return %c0_i32, %c0_i32_0 : i32, i32
  }
  func.func @transform_8(%arg0: i32) -> (i32, i32) {
    %c0_i32 = arith.constant 0 : i32
    %c0_i32_0 = arith.constant 0 : i32
    %c0_i32_1 = arith.constant 0 : i32
    return %c0_i32, %c0_i32_0 : i32, i32
  }
  func.func @transform_9(%arg0: i32) -> (i32, i32, i32) {
    %c0_i32 = arith.constant 0 : i32
    %c0_i32_0 = arith.constant 0 : i32
    %c0_i32_1 = arith.constant 0 : i32
    return %arg0, %c0_i32, %c0_i32_0 : i32, i32, i32
  }
  func.func @transform_10(%arg0: i32) -> (i32, i32, i32) {
    %c0_i32 = arith.constant 0 : i32
    %c0_i32_0 = arith.constant 0 : i32
    %c0_i32_1 = arith.constant 0 : i32
    %c0_i32_2 = arith.constant 0 : i32
    return %c0_i32, %c0_i32_0, %c0_i32_1 : i32, i32, i32
  }
  func.func @transform_11(%arg0: i32) -> (i32, i32) {
    %c0_i32 = arith.constant 0 : i32
    %c0_i32_0 = arith.constant 0 : i32
    %c0_i32_1 = arith.constant 0 : i32
    return %c0_i32, %c0_i32_0 : i32, i32
  }
  func.func @transform_12(%arg0: i32) -> (i32, i32) {
    %c0_i32 = arith.constant 0 : i32
    %c0_i32_0 = arith.constant 0 : i32
    %c0_i32_1 = arith.constant 0 : i32
    return %c0_i32, %c0_i32_0 : i32, i32
  }
}

</mosaic_0001>

<bundles_post_ra>
// kernel: preadout_rollout.1
= control target key start
LH: loop header
LB: loop body
LE: loop exit
PB: predicated region body
PF: predicated region fallthrough
CT: control target
= control target key end

     0   :  { %v622_v2 = vmov 1   ;;  %v623_v3 = vmov 0   ;;  %vm45_vm0 = vcmask 261120   ;;  %s856_s0 = inlined_call_operand.vmem [shape: f32[1,8,32], index: 0, kind: input, shape index: {}]   ;;  %s857_s1 = inlined_call_operand.vmem [shape: f32[1,16,1], index: 1, kind: input, shape index: {}]   ;;  %s858_s2 = inlined_call_operand.vmem [shape: f32[2,16,32], index: 2, kind: input, shape index: {}, may-alias: {2,10}]   ;;  %s859_s3 = inlined_call_operand.vmem [shape: f32[8,32], index: 3, kind: input, shape index: {}, may-alias: {3,11}]   ;;  %s860_s4 = inlined_call_operand.vmem [shape: f32[8,16], index: 4, kind: input, shape index: {}, may-alias: {4,12}]   ;;  %s861_s5 = inlined_call_operand.vmem [shape: f32[16,32], index: 5, kind: input, shape index: {}]   ;;  %s862_s6 = inlined_call_operand.vmem [shape: f32[2,32], index: 6, kind: input, shape index: {}]   ;;  %s863_s7 = inlined_call_operand.vmem [shape: f32[3,16], index: 7, kind: input, shape index: {}]   ;;  %s864_s8 = inlined_call_operand.vmem [shape: f32[16,5], index: 8, kind: input, shape index: {}]   ;;  %s865_s9 = inlined_call_operand.hbm [shape: f32[1,8,16], index: 9, kind: output, shape index: {0}]   ;;  %s866_s10 = inlined_call_operand.vmem [shape: f32[2,16,32], index: 10, kind: output, shape index: {1}, may-alias: {2,10}]   ;;  %s867_s11 = inlined_call_operand.vmem [shape: f32[8,32], index: 11, kind: output, shape index: {2}, may-alias: {3,11}]   ;;  %s868_s12 = inlined_call_operand.vmem [shape: f32[8,16], index: 12, kind: output, shape index: {3}, may-alias: {4,12}]  }
   0x1   :  { %v699_v0 = vld [vmem:[%s864_s8] sm:$0xff]  ;;  %581 = vset.pattern.permute.xlu1 %v622_v2  ;;  %582 = vset.pattern.permute.xlu0 %v623_v3  ;;  %v57_v4 = vld [vmem:[%s857_s1 + $0x8] sm:$0xff] }
   0x2   :  { %v56_v1 = vld [vmem:[%s857_s1] sm:$0xff]  ;;  %v42_v6 = vld [vmem:[%s858_s2 + $0x8] sm:$0xff]  ;;  %74 = vperm.xlu1 %581, %v699_v0   ;;  %99 = vperm.xlu0 %582, %v699_v0  }
   0x3   :  { %590 = vtanh.f32 %v56_v1  ;;  %v41_v5 = vld [vmem:[%s858_s2] sm:$0xff] }
   0x4   :  { %46 = vst.msk [vmem:[%s866_s10] sm:$0xff] %vm45_vm0, %v41_v5  ;;  %47 = vst.msk [vmem:[%s866_s10 + $0x8] sm:$0xff] %vm45_vm0, %v42_v6 }
   0x5   :  { %18 = vsyncpa [#allocation3], 0  ;;  %v726_v7 = vld [vmem:[%s864_s8 + $0x8] sm:$0xff]  ;;  %592 = vtanh.f32 %v57_v4  ;;  %v624_v12 = vmov 4   ;;  %v625_v13 = vmov 0.0|0.0   ;;  %vm626_vm1 = vmmov 0  }
   0x6   :  { %79 = vperm.xlu1 %581, %v726_v7   ;;  %568 = vmatprep.subr.bf16.mxu0 %v625_v13  ;;  %v627_v14 = vmov 0.0   ;;  %v110_v33 = vld [vmem:[%s861_s5] sm:$0xff]  ;;  %v111_v37 = vld [vmem:[%s861_s5 + $0x8] sm:$0xff]  ;;  %vm570_vm2 = vmpackc.low %vm45_vm0, %vm45_vm0  ;;  %vm53_vm3 = vcmask 130048   ;;  %vm274_vm4 = vcmask 64512  }
   0x7   :  { %555 = vmatprep.mubr.msk.f32.mxu0 %vm626_vm1, %v627_v14  ;;  %v55_v42 = vld [vmem:[%s856_s0] sm:$0xff] }
   0x8   :  { %v528_v43 = vld [vmem:[%s863_s7] ss:$0 sm:$0xff]  ;;  %v534_v57 = vld [vmem:[%s863_s7 + $0x2] ss:$0 sm:$0xff]  ;;  %v535_v59 = vld [vmem:[%s863_s7 + $0x1] ss:$0 sm:$0xff] }
   0x9   :  { %v52_v53 = vld [vmem:[%s860_s4] sm:$0xff] }
   0xa   :  { %583 = vset.pattern.permute.xlu1 %v623_v3  ;;  %54 = vst.msk [vmem:[%s868_s12] sm:$0xff] %vm53_vm3, %v52_v53  ;;  %v50_v56 = vld [vmem:[%s859_s3] sm:$0xff] }
   0xb   :  { %v43_v8 = vld [vmem:[%s858_s2 + $0x10] sm:$0xff]  ;;  %103 = vperm.xlu1 %583, %v726_v7   ;;  %v58_v19 = vld [vmem:[%s866_s10] sm:$0xff]  ;;  %v59_v26 = vld [vmem:[%s866_s10 + $0x8] sm:$0xff]  ;;  %51 = vst.msk [vmem:[%s867_s11] sm:$0xff] %vm45_vm0, %v50_v56 }
   0xc   :  { %48 = vst.msk [vmem:[%s866_s10 + $0x10] sm:$0xff] %vm45_vm0, %v43_v8  ;;  %v533_v60 = vld [vmem:[%s862_s6] ss:$0 sm:$0xff]  ;;  %v532_v2 = vld [vmem:[%s862_s6 + $0x1] ss:$0 sm:$0xff]  ;;  %v628_v8 = vmov 3  }
   0xd   :  { %v591_v10 = vpop.eup %590  ;;  %v229_v1 = vmul.f32 %v533_v60, %v55_v42  ;;  %s630_s6 = smov [#allocation2]  }
   0xe   :  { %88 = vperm.xlu0 %582, %v591_v10  }
   0xf   :  { %v593_v11 = vpop.eup %592  ;;  %585 = vset.pattern.permute.xlu1 %v624_v12 }
  0x10   :  { %117 = vperm.xlu1 %585, %v726_v7  }
  0x11   :  { %v64_v54 = vld [vmem:[%s868_s12] sm:$0xff] }
  0x12   :  { %93 = vperm.xlu0 %582, %v593_v11   ;;  %v235_v62 = vmul.f32 %v534_v57, %v64_v54  ;;  %v63_v4 = vld [vmem:[%s867_s11] sm:$0xff] }
  0x13   :  { %v44_v9 = vld [vmem:[%s858_s2 + $0x18] sm:$0xff]  ;;  %v749_v18 = vld [vmem:[%s866_s10 + $0x10] sm:$0xff]  ;;  %v224_v5 = vmul.f32 %v532_v2, %v63_v4  ;;  %558 = vmatprep.subr.mxu1 %v63_v4 }
  0x14   :  { %49 = vst.msk [vmem:[%s866_s10 + $0x18] sm:$0xff] %vm45_vm0, %v44_v9  ;;  %559 = vmatpush3.msra.mxu1 %v63_v4  ;;  %v629_v9 = vmov 2  }
  0x15   :  { %v230_v6 = vadd.f32 %v229_v1, %v224_v5  ;;  %563 = vmatprep.subr.mxu1 %v55_v42 }
  0x16   :  { %584 = vset.pattern.permute.xlu0 %v624_v12 }
  0x17   :  { %113 = vperm.xlu0 %584, %v699_v0   ;;  %498 = vst.msk [vmem:[%s867_s11] sm:$0xff] %vm45_vm0, %v230_v6  ;;  %s506_s11 = sshll.u32 %s630_s6, 4  ;;  %s507_s11 = int_to_ptr.vmem [resolvable:$true] %s506_s11 }
  0x18   :  { %p603_p1 = scmp.lt.s32.totalorder %s507_s11, %s507_s11 }
  0x1b   :  { %v758_v22 = vld [vmem:[%s866_s10 + $0x18] sm:$0xff] }
  0x81   :  { %v75_v15 = vpop.permute.xlu1 %74  ;;  %v100_v16 = vpop.permute.xlu0 %99 }
  0x82   :  { %v82_v24 = vmul.f32 %v75_v15, %v58_v19 }
  0x85   :  { %v80_v17 = vpop.permute.xlu1 %79 }
  0x86   :  { %v83_v30 = vmul.f32 %v80_v17, %v59_v26 }
  0x8a   :  { %v104_v23 = vpop.permute.xlu1 %103 }
  0x8d   :  { %v89_v20 = vpop.permute.xlu0 %88 }
  0x8e   :  { %v96_v21 = vmul.f32 %v749_v18, %v89_v20 }
  0x8f   :  { %v118_v32 = vpop.permute.xlu1 %117 }
  0x90   :  { %v106_v25 = vmul.f32 %v100_v16, %v96_v21 }
  0x91   :  { %v94_v27 = vpop.permute.xlu0 %93 }
  0x92   :  { %v97_v28 = vmul.f32 %v758_v22, %v94_v27  ;;  %v108_v29 = vadd.f32 %v106_v25, %v82_v24 }
  0x94   :  { %v107_v31 = vmul.f32 %v104_v23, %v97_v28  ;;  %494 = vst.msk [vmem:[%s866_s10] sm:$0xff] %vm45_vm0, %v108_v29 }
  0x96   :  { %v114_v34 = vpop.permute.xlu0 %113  ;;  %v109_v35 = vadd.f32 %v107_v31, %v83_v30 }
  0x97   :  { %v120_v36 = vmul.f32 %v114_v34, %v108_v29 }
  0x98   :  { %v121_v38 = vmul.f32 %v118_v32, %v109_v35  ;;  %495 = vst.msk [vmem:[%s866_s10 + $0x8] sm:$0xff] %vm45_vm0, %v109_v35 }
  0x99   :  { %v122_v39 = vadd.f32 %v120_v36, %v110_v33 }
  0x9a   :  { %v123_v40 = vadd.f32 %v121_v38, %v111_v37 }
  0x9c   :  { %v569_v41 = vpack.c.bf16 %v123_v40, %v122_v39 }
  0x9e   :  { %571 = vmatpush3.bf16.xpose.msk.msra.mxu0 %vm570_vm2, %v569_v41 }
  0xa5   :  { %556 = vmatmul.mubr.msk.f32.vlgmr.msra.gmra.mrb[0].mxu0 %vm45_vm0, %v55_v42 }
 0x178   :  { %v204_v44 = vpop.f32.mrb[0].mxu0 }
 0x179   :  { %v205_v45 = vadd.f32 %v528_v43, %v204_v44  ;;  %v557_v46 = vpop.f32.mrb[1].mxu0 }
 0x17b   :  { %v209_v47 = vsel %vm53_vm3, %v205_v45, -inf }
 0x17c   :  { %210 = vmax.xlane.f32.xlu1 %v209_v47 }
 0x1af   :  { %356 = vxpose.xlu1.b32.start.end [1/1] (short) (narrow) %v64_v54, 16 }
 0x1cd   :  { %587 = vset.pattern.permute.xlu1 %v628_v8 }
 0x1d1   :  { %476 = vperm.xlu1 %587, %v726_v7  }
 0x1d5   :  { %588 = vset.pattern.permute.xlu1 %v629_v9 }
 0x1d6   :  { %482 = vperm.xlu1 %588, %v699_v0  }
 0x209   :  { %v211_v48 = vpop.xlane.xlu1 %210 }
 0x20a   :  { %v212_v49 = vsub.f32 %v205_v45, %v211_v48 }
 0x20c   :  { %v213_v50 = vmul.f32 1.442695, %v212_v49 }
 0x20e   :  { %594 = vpow2.f32 %v213_v50 }
 0x218   :  { %v595_v51 = vpop.eup %594 }
 0x219   :  { %v215_v52 = vsel %vm53_vm3, %v595_v51, 0.0 }
 0x21a   :  { %216 = vadd.xlane.f32.xlu0 %v215_v52 }
 0x22f   :  { %v372_v11 = vpop.trf.xlu1 }
 0x233   :  { %v373_v13 = vpop.trf.xlu1 }
 0x2a7   :  { %v217_v55 = vpop.xlane.xlu0 %216 }
 0x2a8   :  { %596 = vrcp.f32 %v217_v55 }
 0x2b2   :  { %v597_v58 = vpop.eup %596 }
 0x2b3   :  { %v219_v61 = vmul.f32 %v597_v58, %v595_v51 }
 0x2b5   :  { %242 = vxpose.xlu0.b32.start.end [1/1] (short) (narrow) %v219_v61, 16  ;;  %493 = vst.msk [vmem:[#allocation2] sm:$0xff] %vm53_vm3, %v219_v61  ;;  %v240_v63 = vmul.f32 %v535_v59, %v219_v61 }
 0x2b7   :  { %v241_v3 = vadd.f32 %v240_v63, %v235_v62 }
 0x2b9   :  { %499 = vst.msk [vmem:[%s868_s12] sm:$0xff] %vm53_vm3, %v241_v3  ;;  %s598_s12 = scalar_lea.vmem %s507_s11, 128 }
 0x2ba   :  { %p599_p0 = scmp.ne.s32.totalorder %s507_s11, %s598_s12  ;;  %p604_p2 = scmp.lt.s32.totalorder %s598_s12, %s598_s12 }
 0x2bc   :  { %p605_p3 = por %p604_p2, %p603_p1 }
 0x2be   :  { %p606_p4 = pnand %p605_p3, %p599_p0 }
 0x2de   :  { %586 = vset.pattern.permute.xlu0 %v628_v8 }
 0x2e2   :  { %472 = vperm.xlu0 %586, %v699_v0  }
 0x2e6   :  { %589 = vset.pattern.permute.xlu0 %v629_v9 }
 0x2e7   :  { %486 = vperm.xlu0 %589, %v726_v7  }
 0x335   :  { %v258_v10 = vpop.trf.xlu0 }
 0x336   :  { %560 = vmatprep.mubr.msk.f32.mxu1 %vm274_vm4, %v258_v10 }
 0x339   :  { %v259_v12 = vpop.trf.xlu0 }
 0x33a   :  { %561 = vmatmul.mubr.msk.f32.vlgmr.msra.gmra.mrb[0].mxu1 %vm274_vm4, %v259_v12 }
 0x33b   :  { %564 = vmatpush3.msra.mxu1 %v55_v42  ;;  %565 = vmatprep.mubr.msk.f32.mxu1 %vm274_vm4, %v372_v11 }
 0x33e   :  { %566 = vmatmul.mubr.msk.f32.vlgmr.msra.gmra.mrb[2].mxu1 %vm274_vm4, %v373_v13 }
 0x33f   :  { %609 = shalt.err (!%p606_p4)
}
 0x340   :  { %s610_s0 = scalar_lea.hbm %s865_s9, 128 }
 0x341   :  { %p611_p5 = scmp.ne.s32.totalorder %s865_s9, %s610_s0  ;;  %p614_p6 = scmp.lt.u32.totalorder %s610_s0, %s865_s9 }
 0x343   :  { %p616_p7 = pnand %p614_p6, %p611_p5 }
 0x345   :  { %619 = shalt.err (!%p616_p7)
}
 0x346   :  { %509 = dma.vmem_to_hbm [thread:$0]  %s507_s11, 128, %s865_s9, [#allocation3]   ;;  %v477_v7 = vpop.permute.xlu1 %476 }
 0x347   :  { %v480_v24 = vmul.f32 %v758_v22, %v477_v7 }
 0x34a   :  { %v483_v21 = vpop.permute.xlu1 %482 }
 0x361   :  { %v473_v0 = vpop.permute.xlu0 %472 }
 0x362   :  { %v479_v26 = vmul.f32 %v749_v18, %v473_v0 }
 0x366   :  { %v487_v17 = vpop.permute.xlu0 %486 }
 0x40d   :  { %v562_v14 = vpop.f32.mrb[0].mxu1 }
 0x40e   :  { %v347_v15 = vpop.f32.mrb[1].mxu1 }
 0x411   :  { %v567_v16 = vpop.f32.mrb[2].mxu1 }
 0x412   :  { %v470_v19 = vsub.f32 %v562_v14, %v567_v16  ;;  %v460_v20 = vpop.f32.mrb[3].mxu1 }
 0x413   :  { %v469_v23 = vsub.f32 %v347_v15, %v460_v20 }
 0x414   :  { %v490_v25 = vmul.f32 %v487_v17, %v470_v19 }
 0x415   :  { %v489_v27 = vmul.f32 %v483_v21, %v469_v23 }
 0x416   :  { %v492_v28 = vadd.f32 %v490_v25, %v480_v24 }
 0x417   :  { %v491_v29 = vadd.f32 %v489_v27, %v479_v26 }
 0x418   :  { %541 = vst.msk [vmem:[%s866_s10 + $0x18] sm:$0xff] %vm45_vm0, %v492_v28 }
 0x419   :  { %540 = vst.msk [vmem:[%s866_s10 + $0x10] sm:$0xff] %vm45_vm0, %v491_v29 }
 0x41a   :  { %620 = dma.done.wait [#allocation3], 128  }
 0x41b   :  { %621 = vsyncadd [#allocation3], 4294967168 }
 0x41c   :  { %525 = vsyncpa [#allocation3], 1 }

</bundles_post_ra>
